<compile_context>
chip_gen: v6e
topology: v6e:2x2x1
jax: 0.10.0
libtpu: 0.0.40
codegen_flags: <defaults>
</compile_context>

<pallas_src>
import functools
import math

import numpy as np
import jax
import jax.numpy as jnp
from jax.experimental import pallas as pl
from jax.experimental.pallas import tpu as pltpu

_SUBLANE = 8
_LANE = 128
_VMEM_LIMIT = 32 * 1024 * 1024        # scoped-VMEM limit handed to Mosaic
_DEFAULT_BUDGET = 24 * 1024 * 1024    # tile-picker budget (headroom under limit)


def _round_up(x, m):
    return ((x + m - 1) // m) * m


def _pos_fn(w, fn):
    """Positive transform, matching MonotonicLayer.pos_fn (math in f32)."""
    if fn == "exp":
        return jnp.exp(w)
    if fn == "square":
        return jnp.square(w)
    if fn == "abs":
        return jnp.abs(w)
    if fn == "sigmoid":
        return jax.nn.sigmoid(w)
    if fn == "tanh_p1":
        return jnp.tanh(w) + 1.0
    # PyTorch silently maps unknown fn -> tanh_p1; raise instead so typos
    # cannot silently change the math (flagged by the review).
    raise ValueError(f"unknown fn={fn!r}; expected exp|square|abs|sigmoid|tanh_p1")


# ---------------------------------------------------------------------------
# Hot-loop kernels.
# ---------------------------------------------------------------------------
def _gemm_bias_kernel(x_ref, wt_ref, b_ref, o_ref):
    """o = x @ w_t + bias  (single resident-K block).  Pure MXU + VPU add."""
    acc = jnp.dot(x_ref[...], wt_ref[...], preferred_element_type=jnp.float32)
    o_ref[...] = (acc + b_ref[...]).astype(o_ref.dtype)


def _gemm_bias_ktiled_kernel(x_ref, wt_ref, b_ref, o_ref, acc_ref):
    """K-tiled GEMM with f32 accumulator; bias add + cast on the last K step."""
    k = pl.program_id(1)

    @pl.when(k == 0)
    def _():
        acc_ref[...] = jnp.zeros_like(acc_ref)

    acc_ref[...] += jnp.dot(x_ref[...], wt_ref[...],
                            preferred_element_type=jnp.float32)

    @pl.when(k == pl.num_programs(1) - 1)
    def _():
        o_ref[...] = (acc_ref[...] + b_ref[...]).astype(o_ref.dtype)


# ---------------------------------------------------------------------------
# Tile picking: largest batch tile within the VMEM budget, then pad B to it.
# ---------------------------------------------------------------------------
def _pick_tile_b(B, per_row_bytes, resident_bytes, budget):
    tile = _SUBLANE
    for cand in (2048, 1024, 512, 256, 128, 64, 32, 16, 8):
        if resident_bytes + cand * per_row_bytes <= budget:
            tile = cand
            break
    # Never pad past the (sublane-aligned) batch.
    tile = min(tile, _round_up(B, _SUBLANE))
    # Keep >= 2 grid steps once the batch is big enough so the "parallel"
    # batch axis can shard across both TensorCores on v7x (no cost elsewhere).
    if B >= 16:
        tile = min(tile, _round_up((B + 1) // 2, _SUBLANE))
    return max(tile, _SUBLANE)


# ---------------------------------------------------------------------------
# Wrapper.
# ---------------------------------------------------------------------------
@functools.partial(
    jax.jit,
    static_argnames=("fn", "compute_dtype", "tile_k", "vmem_budget_bytes"))
def monotonic_layer(x, weight, bias=None, *, fn="exp", compute_dtype=None,
                    tile_k=None, vmem_budget_bytes=_DEFAULT_BUDGET):
    """x: (B, IN), weight: (OUT, IN), bias: (OUT,) or None -> (B, OUT)."""
    B, IN = x.shape
    OUT, IN_w = weight.shape
    assert IN == IN_w, "weight / in_features mismatch"
    out_dtype = x.dtype
    cdtype = np.dtype(compute_dtype) if compute_dtype is not None else np.dtype(out_dtype)

    if bias is None:
        bias = jnp.zeros((OUT,), jnp.float32)

    # --- one-time prologue in plain XLA (fuses with the pads below) ---
    w_t = _pos_fn(weight.astype(jnp.float32), fn).T.astype(cdtype)   # (IN, OUT)
    b_row = bias.astype(jnp.float32).reshape(1, OUT)                 # f32 bias
    x_c = x.astype(cdtype)

    xb = cdtype.itemsize                    # bytes/elem of x and w_t
    ob = np.dtype(out_dtype).itemsize       # bytes/elem of the output
    fb = 4                                  # f32 accumulator / bias bytes

    # --- single resident-K vs K-tiled decision ---
    resident_single = IN * OUT * xb + OUT * fb          # Buffered(1) wt + bias
    row_single = 2 * IN * xb + 2 * OUT * ob             # double-buffered x + out
    use_k_tiling = (tile_k is not None) or (
        resident_single + _LANE * row_single > vmem_budget_bytes)

    if not use_k_tiling:
        # ------------------- single-K path (weight resident) -------------------
        tile_b = _pick_tile_b(B, row_single, resident_single, vmem_budget_bytes)
        b_pad = _round_up(B, tile_b)
        x_p = jnp.pad(x_c, ((0, b_pad - B), (0, 0))) if b_pad != B else x_c

        cost = pl.CostEstimate(
            flops=2 * b_pad * IN * OUT,
            transcendentals=0,
            bytes_accessed=(b_pad * IN * xb + IN * OUT * xb + OUT * fb
                            + b_pad * OUT * ob))

        out_p = pl.pallas_call(
            _gemm_bias_kernel,
            out_shape=jax.ShapeDtypeStruct((b_pad, OUT), out_dtype),
            grid=(b_pad // tile_b,),
            in_specs=[
                pl.BlockSpec((tile_b, IN), lambda i: (i, 0)),        # batch tile
                pl.BlockSpec((IN, OUT), lambda i: (0, 0),            # resident W^T
                             pipeline_mode=pl.Buffered(1)),
                pl.BlockSpec((1, OUT), lambda i: (0, 0),             # resident bias
                             pipeline_mode=pl.Buffered(1)),
            ],
            out_specs=pl.BlockSpec((tile_b, OUT), lambda i: (i, 0)),
            compiler_params=pltpu.CompilerParams(
                dimension_semantics=("parallel",),
                vmem_limit_bytes=_VMEM_LIMIT),
            cost_estimate=cost,
        )(x_p, w_t, b_row)
    else:
        # --------------------------- K-tiled path ------------------------------
        if tile_k is not None:
            tk = _round_up(min(tile_k, _round_up(IN, _LANE)), _LANE)
        else:
            tk = _LANE
            for cand in (1024, 512, 256, 128):
                need = (2 * cand * OUT * xb + OUT * fb
                        + _SUBLANE * (2 * cand * xb + 2 * OUT * ob + OUT * fb))
                if need <= vmem_budget_bytes:
                    tk = cand
                    break
        in_pad = _round_up(IN, tk)

        resident = 2 * tk * OUT * xb + OUT * fb              # db'd W^T tile + bias
        row = 2 * tk * xb + 2 * OUT * ob + OUT * fb          # x, out blocks + acc
        tile_b = _pick_tile_b(B, row, resident, vmem_budget_bytes)
        b_pad = _round_up(B, tile_b)

        # Zero-padded x columns contribute 0 regardless of padded W rows;
        # W rows are zero-padded anyway for cleanliness.
        x_p = jnp.pad(x_c, ((0, b_pad - B), (0, in_pad - IN)))
        w_tp = jnp.pad(w_t, ((0, in_pad - IN), (0, 0)))

        cost = pl.CostEstimate(
            flops=2 * b_pad * in_pad * OUT,
            transcendentals=0,
            bytes_accessed=(b_pad * in_pad * xb + in_pad * OUT * xb + OUT * fb
                            + b_pad * OUT * ob))

        out_p = pl.pallas_call(
            _gemm_bias_ktiled_kernel,
            out_shape=jax.ShapeDtypeStruct((b_pad, OUT), out_dtype),
            grid=(b_pad // tile_b, in_pad // tk),
            in_specs=[
                pl.BlockSpec((tile_b, tk), lambda i, k: (i, k)),
                pl.BlockSpec((tk, OUT), lambda i, k: (k, 0)),
                pl.BlockSpec((1, OUT), lambda i, k: (0, 0),
                             pipeline_mode=pl.Buffered(1)),
            ],
            out_specs=pl.BlockSpec((tile_b, OUT), lambda i, k: (i, 0)),
            scratch_shapes=[pltpu.VMEM((tile_b, OUT), jnp.float32)],
            compiler_params=pltpu.CompilerParams(
                dimension_semantics=("parallel", "arbitrary"),
                vmem_limit_bytes=_VMEM_LIMIT),
            cost_estimate=cost,
        )(x_p, w_tp, b_row)

    return out_p[:B] if b_pad != B else out_p


def _ref(x, weight, bias, fn="exp"):
    wt = _pos_fn(weight.astype(jnp.float32), fn).T
    return (jnp.matmul(x.astype(jnp.float32), wt,
                       precision=jax.lax.Precision.HIGHEST)
            + bias[None, :])


if __name__ == "__main__":
    key = jax.random.PRNGKey(0)
    k_x, k_w, k_b, k_x2, k_w3 = jax.random.split(key, 5)

    # Shapes consistent with the module: batch=8, in_features=32, out_features=16.
    B, IN, OUT = 8, 32, 16
    # Deterministic init matching reset_parameters() for fn='exp':
    #   weight ~ Normal(mean=log(1/in_features), std=1)
    #   bias   ~ Uniform(-1/in_features, 1/in_features)
    w_mean = math.log(1.0 / IN)
    weight = w_mean + jax.random.normal(k_w, (OUT, IN), dtype=jnp.float32)
    bias = jax.random.uniform(k_b, (OUT,), dtype=jnp.float32,
                              minval=-1.0 / IN, maxval=1.0 / IN)
    x = jax.random.normal(k_x, (B, IN), dtype=jnp.float32)

    # 1) Default f32 path.
    out = jax.block_until_ready(monotonic_layer(x, weight, bias))
    ref = _ref(x, weight, bias)
    assert out.shape == (B, OUT)
    assert jnp.allclose(out, ref, atol=1e-3, rtol=1e-3), "f32 path mismatch"

    # 2) Awkward (non power-of-two) batch: exercises pad-to-tile.
    B2 = 13
    x2 = jax.random.normal(k_x2, (B2, IN), dtype=jnp.float32)
    out2 = jax.block_until_ready(monotonic_layer(x2, weight, bias))
    assert out2.shape == (B2, OUT)
    assert jnp.allclose(out2, _ref(x2, weight, bias), atol=1e-3, rtol=1e-3), \
        "padded-batch path mismatch"

    # 3) Forced K-tiled path (f32 accumulator + pl.when init/finalize).
    IN3, B3 = 256, 64
    w3 = math.log(1.0 / IN3) + jax.random.normal(k_w3, (OUT, IN3), dtype=jnp.float32)
    x3 = jax.random.normal(k_x, (B3, IN3), dtype=jnp.float32)
    out3 = jax.block_until_ready(monotonic_layer(x3, w3, bias, tile_k=128))
    assert out3.shape == (B3, OUT)
    assert jnp.allclose(out3, _ref(x3, w3, bias), atol=1e-3, rtol=1e-3), \
        "K-tiled path mismatch"

    # 4) bf16 compute path (v6e/v7x MXU-native); f32 accumulate, looser tol.
    out4 = jax.block_until_ready(
        monotonic_layer(x, weight, bias, compute_dtype=jnp.bfloat16))
    assert jnp.allclose(out4, ref, atol=3e-2, rtol=3e-2), "bf16 path mismatch"

    print("KERNEL_OK")
</pallas_src>

<mosaic_0001>
module attributes {stable_mosaic.version = 11 : i64} {
  func.func @_gemm_bias_kernel(%arg0: i32, %arg1: memref<8x32xf32, #tpu.memory_space<vmem>>, %arg2: memref<32x16xf32, #tpu.memory_space<vmem>>, %arg3: memref<1x16xf32, #tpu.memory_space<vmem>>, %arg4: memref<8x16xf32, #tpu.memory_space<vmem>>) attributes {dimension_semantics = [#tpu.dimension_semantics<parallel>], iteration_bounds = array<i64: 1>, scalar_prefetch = 0 : i64, scratch_operands = 0 : i64, tpu.core_type = #tpu.core_type<tc>, window_params = [{transform_indices = @transform_0, window_bounds = array<i64: 8, 32>}, {pipeline_mode = #tpu.pipeline_mode<synchronous>, transform_indices = @transform_1, window_bounds = array<i64: 32, 16>}, {pipeline_mode = #tpu.pipeline_mode<synchronous>, transform_indices = @transform_2, window_bounds = array<i64: 1, 16>}, {transform_indices = @transform_3, window_bounds = array<i64: 8, 16>}]} {
    %c0 = arith.constant 0 : index
    %c0_0 = arith.constant 0 : index
    %0 = vector.load %arg1[%c0, %c0_0] : memref<8x32xf32, #tpu.memory_space<vmem>>, vector<8x32xf32>
    %c0_1 = arith.constant 0 : index
    %c0_2 = arith.constant 0 : index
    %1 = vector.load %arg2[%c0_1, %c0_2] : memref<32x16xf32, #tpu.memory_space<vmem>>, vector<32x16xf32>
    %cst = arith.constant dense<0.000000e+00> : vector<8x16xf32>
    %2 = tpu.matmul %0, %1, %cst {dimension_numbers = #tpu.dot_dimension_numbers<[1], [0], [0], [1], [0, 0, 1, 1], [], []>} : vector<8x32xf32>, vector<32x16xf32>, vector<8x16xf32> -> vector<8x16xf32>
    %c0_3 = arith.constant 0 : index
    %c0_4 = arith.constant 0 : index
    %3 = vector.load %arg3[%c0_3, %c0_4] : memref<1x16xf32, #tpu.memory_space<vmem>>, vector<1x16xf32>
    %4 = vector.broadcast %3 : vector<1x16xf32> to vector<8x16xf32>
    %5 = arith.addf %2, %4 : vector<8x16xf32>
    %c0_5 = arith.constant 0 : index
    %c0_6 = arith.constant 0 : index
    %6 = vector.load %arg4[%c0_5, %c0_6] : memref<8x16xf32, #tpu.memory_space<vmem>>, vector<8x16xf32>
    tpu.vector_store %arg4[%c0_5, %c0_6], %5 {strides = array<i32>} : memref<8x16xf32, #tpu.memory_space<vmem>>, vector<8x16xf32>,
    return
  }
  func.func @transform_0(%arg0: i32) -> (i32, i32) {
    %c0_i32 = arith.constant 0 : i32
    %c0_i32_0 = arith.constant 0 : i32
    return %arg0, %c0_i32 : i32, i32
  }
  func.func @transform_1(%arg0: i32) -> (i32, i32) {
    %c0_i32 = arith.constant 0 : i32
    %c0_i32_0 = arith.constant 0 : i32
    %c0_i32_1 = arith.constant 0 : i32
    return %c0_i32, %c0_i32_0 : i32, i32
  }
  func.func @transform_2(%arg0: i32) -> (i32, i32) {
    %c0_i32 = arith.constant 0 : i32
    %c0_i32_0 = arith.constant 0 : i32
    %c0_i32_1 = arith.constant 0 : i32
    return %c0_i32, %c0_i32_0 : i32, i32
  }
  func.func @transform_3(%arg0: i32) -> (i32, i32) {
    %c0_i32 = arith.constant 0 : i32
    %c0_i32_0 = arith.constant 0 : i32
    return %arg0, %c0_i32 : i32, i32
  }
}

</mosaic_0001>

<bundles_post_ra>
// kernel: monotonic_layer.1
= control target key start
LH: loop header
LB: loop body
LE: loop exit
PB: predicated region body
PF: predicated region fallthrough
CT: control target
= control target key end

     0   :  { %v160_v1 = vmov 0.0   ;;  %vm161_vm0 = vmmov 0   ;;  %s204_s0 = inlined_call_operand.vmem [shape: f32[8,32], index: 0, kind: input, shape index: {}]   ;;  %s205_s1 = inlined_call_operand.vmem [shape: f32[32,16], index: 1, kind: input, shape index: {}]   ;;  %s206_s2 = inlined_call_operand.vmem [shape: f32[1,16], index: 2, kind: input, shape index: {}]   ;;  %s207_s3 = inlined_call_operand.hbm [shape: f32[8,16], index: 3, kind: output, shape index: {}]  }
   0x1   :  { %v19_v0 = vld [vmem:[%s205_s1 + $0x18] sm:$0xff]  ;;  %124 = vmatprep.subr.mxu0 %v160_v1  ;;  %v18_v2 = vld [vmem:[%s205_s1 + $0x10] sm:$0xff]  ;;  %132 = vmatprep.mubr.msk.f32.mxu0 %vm161_vm0, %v160_v1 }
   0x2   :  { %125 = vmatpush3.msra.mxu0 %v19_v0 }
   0x3   :  { %8 = vsyncpa [#allocation3], 0  ;;  %126 = vmatprep.subr.mxu0 %v160_v1  ;;  %v17_v3 = vld [vmem:[%s205_s1 + $0x8] sm:$0xff]  ;;  %v16_v4 = vld [vmem:[%s205_s1] sm:$0xff]  ;;  %vm27_vm1 = vcmask 261120   ;;  %s162_s24 = smov [#allocation2]  }
   0x4   :  { %127 = vmatpush3.msra.mxu0 %v18_v2  ;;  %v15_v5 = vld [vmem:[%s204_s0] sm:$0xff]  ;;  %s109_s25 = sshll.u32 %s162_s24, 4  ;;  %vm101_vm2 = vcmask 130048   ;;  %s110_s25 = int_to_ptr.vmem [resolvable:$true] %s109_s25 }
   0x5   :  { %128 = vmatprep.subr.mxu0 %v160_v1  ;;  %v117_v6 = vld [vmem:[%s206_s2] ss:$0 sm:$0xff]  ;;  %s138_s1 = scalar_lea.vmem %s110_s25, 128  ;;  %p143_p1 = scmp.lt.s32.totalorder %s110_s25, %s110_s25 }
   0x6   :  { %129 = vmatpush3.msra.mxu0 %v17_v3  ;;  %p139_p0 = scmp.ne.s32.totalorder %s110_s25, %s138_s1  ;;  %p144_p2 = scmp.lt.s32.totalorder %s138_s1, %s138_s1 }
   0x7   :  { %130 = vmatprep.subr.mxu0 %v160_v1 }
   0x8   :  { %131 = vmatpush3.msra.mxu0 %v16_v4  ;;  %p145_p3 = por %p144_p2, %p143_p1 }
   0x9   :  { %133 = vmatmul.mubr.msk.f32.vlgmr.msra.gmra.mxu0 %vm27_vm1, %v15_v5 }
   0xa   :  { %p146_p4 = pnand %p145_p3, %p139_p0 }
  0xc9   :  { %v97_v7 = vpop.f32.mrf.mxu0 }
  0xca   :  { %v98_v8 = vadd.f32 %v117_v6, %v97_v7 }
  0xcb   :  { %v134_v9 = vpop.f32.mrf.mxu0 }
  0xcc   :  { %102 = vst.msk [vmem:[#allocation2] sm:$0xff] %vm101_vm2, %v98_v8 }
  0xcd   :  { %149 = shalt.err (!%p146_p4)
}
  0xce   :  { %112 = dma.vmem_to_hbm [thread:$0]  %s110_s25, 128, %s207_s3, [#allocation3]  }
  0xcf   :  { %158 = dma.done.wait [#allocation3], 128  }
  0xd0   :  { %159 = vsyncadd [#allocation3], 4294967168 }
  0xd1   :  { %116 = vsyncpa [#allocation3], 1 }

</bundles_post_ra>
